<compile_context>
chip_gen: v5e
topology: v5e:2x2
jax: 0.10.0
libtpu: 0.0.40
codegen_flags: <defaults>
</compile_context>

<pallas_src>
import numpy as np
import jax
import jax.numpy as jnp
from jax.experimental import pallas as pl
from jax.experimental.pallas import tpu as pltpu


def _cross_product_kernel(left_ref, right_ref, out_ref):
    # left_ref / right_ref: (TD, C, TL), out_ref: (TD, C*C, TL).
    # TL is the lane-dense merged (R*N) axis.
    c = left_ref.shape[1]
    left = left_ref[...]
    right = right_ref[...]
    for i in range(c):  # C is small: static unroll of row-block stores.
        # Sublane-broadcast left channel i against all C right channels and
        # emit one full-lane-width row block (unmasked vst when TL % 128 == 0).
        out_ref[:, i * c:(i + 1) * c, :] = left[:, i:i + 1, :] + right


def _round_up(a: int, b: int) -> int:
    return -(-a // b) * b


def _choose_tiles(d_out: int, c: int, lanes: int, itemsize: int):
    """Pick (TD, TL) block sizes.

    VMEM is budgeted with PADDED tile sizes (last two dims rounded to (8,128))
    and double buffering, sized conservatively against v7x's 64 MiB physical
    VMEM (plenty of slack on v5e/v6e's 128 MiB).
    """
    c_pad = _round_up(c, 8)
    cc_pad = _round_up(c * c, 8)
    budget = 12 * 1024 * 1024
    # Double-buffered bytes per (one d-row, 128 lanes): 2 inputs + 1 output.
    row_bytes_per_lane = 2 * (2 * c_pad + cc_pad) * itemsize

    max_lane_tile = max(128, (budget // (row_bytes_per_lane * 128)) * 128)
    max_lane_tile = min(max_lane_tile, 2048)
    tl = lanes if lanes <= max_lane_tile else max_lane_tile
    tl_pad = _round_up(tl, 128)

    per_d = row_bytes_per_lane * tl_pad           # double-buffered bytes per Dout row
    td = int(max(1, min(d_out, budget // max(per_d, 1))))

    # For large problems keep >= ~8 grid steps so both v7x TensorCores (and the
    # DMA pipeline) have work, but never shrink blocks on small problems.
    n_l = -(-lanes // tl)
    n_d = -(-d_out // td)
    out_bytes_total = d_out * cc_pad * _round_up(lanes, 128) * itemsize
    if n_d * n_l < 8 and out_bytes_total >= (8 << 20):
        want_d_steps = max(1, 8 // n_l)
        td = min(td, max(1, -(-d_out // want_d_steps)))
    return td, tl


def cross_product_forward(x: jax.Array) -> jax.Array:
    """x: [N, D, C, R] -> [N, D//2, C*C, R] (D assumed even)."""
    n, d, c, r = x.shape
    assert d % 2 == 0, "this kernel implements the even-in_features case"
    d_out = d // 2
    lanes = r * n
    itemsize = jnp.dtype(x.dtype).itemsize

    # Free reshape: feature axis -> (Dout, cardinality=2); slot 0 = even scopes
    # (left), slot 1 = odd scopes (right).  One transpose puts the batch on
    # lanes; the even/odd split itself is fused into the BlockSpecs below.
    x_t = jnp.transpose(x.reshape(n, d_out, 2, c, r), (1, 2, 3, 4, 0))
    x_t = x_t.reshape(d_out, 2, c, lanes)          # [Dout, 2, C, R*N]

    td, tl = _choose_tiles(d_out, c, lanes, itemsize)
    grid = (-(-d_out // td), -(-lanes // tl))

    # Two views of the SAME HBM array: the Squeezed cardinality axis selects
    # slot 0 (even features / left) vs slot 1 (odd features / right).
    left_spec = pl.BlockSpec((td, pl.Squeezed(), c, tl),
                             lambda di, li: (di, 0, 0, li))
    right_spec = pl.BlockSpec((td, pl.Squeezed(), c, tl),
                              lambda di, li: (di, 1, 0, li))
    out_spec = pl.BlockSpec((td, c * c, tl), lambda di, li: (di, 0, li))

    bytes_accessed = (d_out * 2 * c * lanes + d_out * c * c * lanes) * itemsize
    cost = pl.CostEstimate(flops=d_out * c * c * lanes,
                           transcendentals=0,
                           bytes_accessed=bytes_accessed)

    out_t = pl.pallas_call(
        _cross_product_kernel,
        out_shape=jax.ShapeDtypeStruct((d_out, c * c, lanes), x.dtype),
        grid_spec=pltpu.PrefetchScalarGridSpec(
            num_scalar_prefetch=0,
            grid=grid,
            in_specs=[left_spec, right_spec],
            out_specs=out_spec,
        ),
        compiler_params=pltpu.CompilerParams(
            dimension_semantics=("parallel", "parallel"),
            vmem_limit_bytes=48 * 1024 * 1024,   # v7x-safe (64 MiB physical)
        ),
        cost_estimate=cost,
    )(x_t, x_t)   # same buffer twice: no copy, split handled by the BlockSpecs

    # Back to the PyTorch layout [N, Dout, C*C, R]; pure layout plumbing (free
    # reshape + one XLA transpose).  Consumers that accept batch-last layout
    # can drop this transpose.
    return jnp.transpose(out_t.reshape(d_out, c * c, r, n), (3, 0, 1, 2))


def cross_product_reference(x: jax.Array) -> jax.Array:
    """Pure-JAX reference mirroring the PyTorch forward."""
    n, d, c, r = x.shape
    d_out = d // 2
    left = x[:, 0::2, :, :][:, :, :, None, :]   # (N, Dout, C, 1, R)
    right = x[:, 1::2, :, :][:, :, None, :, :]  # (N, Dout, 1, C, R)
    return (left + right).reshape(n, d_out, c * c, r)


if __name__ == "__main__":
    # Shapes consistent with CrossProduct(in_features=8, in_channels=4,
    # num_repetitions=2): x is [batch, in_features, in_channels, num_repetitions].
    N, D, C, R = 2, 8, 4, 2
    key = jax.random.PRNGKey(0)
    x = jax.random.normal(key, (N, D, C, R), dtype=jnp.float32)

    forward = jax.jit(cross_product_forward)
    out = jax.block_until_ready(forward(x))

    ref = cross_product_reference(x)
    assert out.shape == (N, D // 2, C * C, R), out.shape
    assert out.dtype == x.dtype
    np.testing.assert_allclose(np.asarray(out), np.asarray(ref), rtol=1e-6, atol=1e-6)

    print("KERNEL_OK")
</pallas_src>

<mosaic_0001>
module attributes {stable_mosaic.version = 11 : i64} {
  func.func @_cross_product_kernel(%arg0: i32, %arg1: i32, %arg2: memref<4x1x4x4xf32, #tpu.memory_space<vmem>>, %arg3: memref<4x1x4x4xf32, #tpu.memory_space<vmem>>, %arg4: memref<4x16x4xf32, #tpu.memory_space<vmem>>) attributes {dimension_semantics = [#tpu.dimension_semantics<parallel>, #tpu.dimension_semantics<parallel>], iteration_bounds = array<i64: 1, 1>, scalar_prefetch = 0 : i64, scratch_operands = 0 : i64, tpu.core_type = #tpu.core_type<tc>, window_params = [{transform_indices = @transform_0, window_bounds = array<i64: 4, 1, 4, 4>}, {transform_indices = @transform_1, window_bounds = array<i64: 4, 1, 4, 4>}, {transform_indices = @transform_2, window_bounds = array<i64: 4, 16, 4>}]} {
    %c0 = arith.constant 0 : index
    %c0_0 = arith.constant 0 : index
    %c0_1 = arith.constant 0 : index
    %c0_2 = arith.constant 0 : index
    %0 = vector.load %arg2[%c0, %c0_0, %c0_1, %c0_2] : memref<4x1x4x4xf32, #tpu.memory_space<vmem>>, vector<4x1x4x4xf32>
    %1 = vector.shape_cast %0 : vector<4x1x4x4xf32> to vector<4x4x4xf32>
    %c0_3 = arith.constant 0 : index
    %c0_4 = arith.constant 0 : index
    %c0_5 = arith.constant 0 : index
    %c0_6 = arith.constant 0 : index
    %2 = vector.load %arg3[%c0_3, %c0_4, %c0_5, %c0_6] : memref<4x1x4x4xf32, #tpu.memory_space<vmem>>, vector<4x1x4x4xf32>
    %3 = vector.shape_cast %2 : vector<4x1x4x4xf32> to vector<4x4x4xf32>
    %4 = vector.extract_strided_slice %1 {offsets = [0, 0, 0], sizes = [4, 1, 4], strides = [1, 1, 1]} : vector<4x4x4xf32> to vector<4x1x4xf32>
    %5 = vector.broadcast %4 : vector<4x1x4xf32> to vector<4x4x4xf32>
    %6 = arith.addf %5, %3 : vector<4x4x4xf32>
    %c0_7 = arith.constant 0 : index
    %c0_8 = arith.constant 0 : index
    %c0_9 = arith.constant 0 : index
    %7 = vector.load %arg4[%c0_7, %c0_8, %c0_9] : memref<4x16x4xf32, #tpu.memory_space<vmem>>, vector<4x4x4xf32>
    tpu.vector_store %arg4[%c0_7, %c0_8, %c0_9], %6 {strides = array<i32>} : memref<4x16x4xf32, #tpu.memory_space<vmem>>, vector<4x4x4xf32>,
    %8 = vector.extract_strided_slice %1 {offsets = [0, 1, 0], sizes = [4, 1, 4], strides = [1, 1, 1]} : vector<4x4x4xf32> to vector<4x1x4xf32>
    %9 = vector.broadcast %8 : vector<4x1x4xf32> to vector<4x4x4xf32>
    %10 = arith.addf %9, %3 : vector<4x4x4xf32>
    %c0_10 = arith.constant 0 : index
    %c4 = arith.constant 4 : index
    %c0_11 = arith.constant 0 : index
    %11 = vector.load %arg4[%c0_10, %c4, %c0_11] : memref<4x16x4xf32, #tpu.memory_space<vmem>>, vector<4x4x4xf32>
    tpu.vector_store %arg4[%c0_10, %c4, %c0_11], %10 {strides = array<i32>} : memref<4x16x4xf32, #tpu.memory_space<vmem>>, vector<4x4x4xf32>,
    %12 = vector.extract_strided_slice %1 {offsets = [0, 2, 0], sizes = [4, 1, 4], strides = [1, 1, 1]} : vector<4x4x4xf32> to vector<4x1x4xf32>
    %13 = vector.broadcast %12 : vector<4x1x4xf32> to vector<4x4x4xf32>
    %14 = arith.addf %13, %3 : vector<4x4x4xf32>
    %c0_12 = arith.constant 0 : index
    %c8 = arith.constant 8 : index
    %c0_13 = arith.constant 0 : index
    %15 = vector.load %arg4[%c0_12, %c8, %c0_13] : memref<4x16x4xf32, #tpu.memory_space<vmem>>, vector<4x4x4xf32>
    tpu.vector_store %arg4[%c0_12, %c8, %c0_13], %14 {strides = array<i32>} : memref<4x16x4xf32, #tpu.memory_space<vmem>>, vector<4x4x4xf32>,
    %16 = vector.extract_strided_slice %1 {offsets = [0, 3, 0], sizes = [4, 1, 4], strides = [1, 1, 1]} : vector<4x4x4xf32> to vector<4x1x4xf32>
    %17 = vector.broadcast %16 : vector<4x1x4xf32> to vector<4x4x4xf32>
    %18 = arith.addf %17, %3 : vector<4x4x4xf32>
    %c0_14 = arith.constant 0 : index
    %c12 = arith.constant 12 : index
    %c0_15 = arith.constant 0 : index
    %19 = vector.load %arg4[%c0_14, %c12, %c0_15] : memref<4x16x4xf32, #tpu.memory_space<vmem>>, vector<4x4x4xf32>
    tpu.vector_store %arg4[%c0_14, %c12, %c0_15], %18 {strides = array<i32>} : memref<4x16x4xf32, #tpu.memory_space<vmem>>, vector<4x4x4xf32>,
    return
  }
  func.func @transform_0(%arg0: i32, %arg1: i32) -> (i32, i32, i32, i32) {
    %c0_i32 = arith.constant 0 : i32
    %c0_i32_0 = arith.constant 0 : i32
    %c0_i32_1 = arith.constant 0 : i32
    return %arg0, %c0_i32, %c0_i32_0, %arg1 : i32, i32, i32, i32
  }
  func.func @transform_1(%arg0: i32, %arg1: i32) -> (i32, i32, i32, i32) {
    %c1_i32 = arith.constant 1 : i32
    %c0_i32 = arith.constant 0 : i32
    %c0_i32_0 = arith.constant 0 : i32
    return %arg0, %c1_i32, %c0_i32, %arg1 : i32, i32, i32, i32
  }
  func.func @transform_2(%arg0: i32, %arg1: i32) -> (i32, i32, i32) {
    %c0_i32 = arith.constant 0 : i32
    %c0_i32_0 = arith.constant 0 : i32
    return %arg0, %c0_i32, %arg1 : i32, i32, i32
  }
}

</mosaic_0001>

<bundles_post_ra>
// kernel: cross_product_forward.1
= control target key start
LH: loop header
LB: loop body
LE: loop exit
PB: predicated region body
PF: predicated region fallthrough
CT: control target
= control target key end

     0   :  { %vm138_vm0 = vcmask 27648   ;;  %s298_s0 = inlined_call_operand.vmem [shape: f32[4,2,4,4], index: 0, kind: input, shape index: {}, may-alias: {0,1}]   ;;  %s299_s1 = inlined_call_operand.vmem [shape: f32[4,2,4,4], index: 1, kind: input, shape index: {}, may-alias: {0,1}]   ;;  %s300_s2 = inlined_call_operand.vmem [shape: f32[4,16,4], index: 2, kind: output, shape index: {}]  }
   0x1   :  { %v25_v0 = vld [vmem:[%s298_s0] sm:$0xf]  ;;  %v27_v1 = vld [vmem:[%s298_s0 + $0x8] sm:$0xf]  ;;  %v29_v2 = vld [vmem:[%s298_s0 + $0x10] sm:$0xf] }
   0x2   :  { %26 = vst [vmem:[#allocation2] sm:$0xf] %v25_v0  ;;  %v31_v3 = vld [vmem:[%s298_s0 + $0x18] sm:$0xf]  ;;  %v191_v4 = vld [vmem:[%s299_s1 + $0x4] sm:$0xf] }
   0x3   :  { %28 = vst [vmem:[#allocation2 + $0x4] sm:$0xf] %v27_v1  ;;  %v192_v5 = vld [vmem:[%s299_s1 + $0xc] sm:$0xf]  ;;  %v193_v6 = vld [vmem:[%s299_s1 + $0x14] sm:$0xf] }
   0x4   :  { %30 = vst [vmem:[#allocation2 + $0x8] sm:$0xf] %v29_v2  ;;  %v194_v7 = vld [vmem:[%s299_s1 + $0x1c] sm:$0xf] }
   0x5   :  { %32 = vst [vmem:[#allocation2 + $0xc] sm:$0xf] %v31_v3 }
   0x6   :  { %82 = vst [vmem:[#allocation3] sm:$0xf] %v191_v4 }
   0x7   :  { %84 = vst [vmem:[#allocation3 + $0x4] sm:$0xf] %v192_v5 }
   0x8   :  { %86 = vst [vmem:[#allocation3 + $0x8] sm:$0xf] %v193_v6 }
   0x9   :  { %88 = vst [vmem:[#allocation3 + $0xc] sm:$0xf] %v194_v7  ;;  %v122_v8 = vld [vmem:[#allocation2] sm:$0xf] }
   0xa   :  { %v130_v9 = vperm.slane %v122_v8, 0  ;;  %v123_v10 = vld [vmem:[#allocation2 + $0x4] sm:$0xf]  ;;  %v143_v15 = vperm.slane %v122_v8, 1  ;;  %v155_v28 = vperm.slane %v122_v8, 2  ;;  %v167_v37 = vperm.slane %v122_v8, 3 }
   0xb   :  { %v131_v11 = vperm.slane %v123_v10, 0  ;;  %v124_v12 = vld [vmem:[#allocation2 + $0x8] sm:$0xf]  ;;  %v144_v18 = vperm.slane %v123_v10, 1  ;;  %v156_v31 = vperm.slane %v123_v10, 2  ;;  %v168_v39 = vperm.slane %v123_v10, 3 }
   0xc   :  { %v132_v13 = vperm.slane %v124_v12, 0  ;;  %v125_v14 = vld [vmem:[#allocation2 + $0xc] sm:$0xf]  ;;  %v145_v21 = vperm.slane %v124_v12, 1  ;;  %v157_v33 = vperm.slane %v124_v12, 2  ;;  %v169_v41 = vperm.slane %v124_v12, 3 }
   0xd   :  { %v126_v16 = vld [vmem:[#allocation3] sm:$0xf]  ;;  %v133_v17 = vperm.slane %v125_v14, 0  ;;  %v146_v24 = vperm.slane %v125_v14, 1  ;;  %v158_v35 = vperm.slane %v125_v14, 2  ;;  %v170_v43 = vperm.slane %v125_v14, 3 }
   0xe   :  { %v134_v19 = vadd.f32 %v130_v9, %v126_v16  ;;  %v127_v20 = vld [vmem:[#allocation3 + $0x4] sm:$0xf]  ;;  %v147_v27 = vadd.f32 %v143_v15, %v126_v16  ;;  %v159_v36 = vadd.f32 %v155_v28, %v126_v16  ;;  %v171_v44 = vadd.f32 %v167_v37, %v126_v16 }
   0xf   :  { %v135_v22 = vadd.f32 %v131_v11, %v127_v20  ;;  %v128_v23 = vld [vmem:[#allocation3 + $0x8] sm:$0xf]  ;;  %v148_v30 = vadd.f32 %v144_v18, %v127_v20  ;;  %v160_v38 = vadd.f32 %v156_v31, %v127_v20  ;;  %v172_v45 = vadd.f32 %v168_v39, %v127_v20 }
  0x10   :  { %139 = vst.msk [vmem:[%s300_s2] sm:$0xf] %vm138_vm0, %v134_v19  ;;  %v136_v25 = vadd.f32 %v132_v13, %v128_v23  ;;  %v129_v26 = vld [vmem:[#allocation3 + $0xc] sm:$0xf]  ;;  %v149_v32 = vadd.f32 %v145_v21, %v128_v23  ;;  %v161_v40 = vadd.f32 %v157_v33, %v128_v23  ;;  %v173_v46 = vadd.f32 %v169_v41, %v128_v23 }
  0x11   :  { %140 = vst.msk [vmem:[%s300_s2 + $0x10] sm:$0xf] %vm138_vm0, %v135_v22  ;;  %v137_v29 = vadd.f32 %v133_v17, %v129_v26  ;;  %v150_v34 = vadd.f32 %v146_v24, %v129_v26  ;;  %v162_v42 = vadd.f32 %v158_v35, %v129_v26  ;;  %v174_v47 = vadd.f32 %v170_v43, %v129_v26 }
  0x12   :  { %141 = vst.msk [vmem:[%s300_s2 + $0x20] sm:$0xf] %vm138_vm0, %v136_v25 }
  0x13   :  { %142 = vst.msk [vmem:[%s300_s2 + $0x30] sm:$0xf] %vm138_vm0, %v137_v29 }
  0x14   :  { %151 = vst.msk [vmem:[%s300_s2 + $0x4] sm:$0xf] %vm138_vm0, %v147_v27 }
  0x15   :  { %152 = vst.msk [vmem:[%s300_s2 + $0x14] sm:$0xf] %vm138_vm0, %v148_v30 }
  0x16   :  { %153 = vst.msk [vmem:[%s300_s2 + $0x24] sm:$0xf] %vm138_vm0, %v149_v32 }
  0x17   :  { %154 = vst.msk [vmem:[%s300_s2 + $0x34] sm:$0xf] %vm138_vm0, %v150_v34 }
  0x18   :  { %163 = vst.msk [vmem:[%s300_s2 + $0x8] sm:$0xf] %vm138_vm0, %v159_v36 }
  0x19   :  { %164 = vst.msk [vmem:[%s300_s2 + $0x18] sm:$0xf] %vm138_vm0, %v160_v38 }
  0x1a   :  { %165 = vst.msk [vmem:[%s300_s2 + $0x28] sm:$0xf] %vm138_vm0, %v161_v40 }
  0x1b   :  { %166 = vst.msk [vmem:[%s300_s2 + $0x38] sm:$0xf] %vm138_vm0, %v162_v42 }
  0x1c   :  { %175 = vst.msk [vmem:[%s300_s2 + $0xc] sm:$0xf] %vm138_vm0, %v171_v44 }
  0x1d   :  { %176 = vst.msk [vmem:[%s300_s2 + $0x1c] sm:$0xf] %vm138_vm0, %v172_v45 }
  0x1e   :  { %177 = vst.msk [vmem:[%s300_s2 + $0x2c] sm:$0xf] %vm138_vm0, %v173_v46 }
  0x1f   :  { %178 = vst.msk [vmem:[%s300_s2 + $0x3c] sm:$0xf] %vm138_vm0, %v174_v47 }

</bundles_post_ra>
